<compile_context>
chip_gen: v7x
topology: tpu7x:2x2x1
jax: 0.10.0
libtpu: 0.0.40
codegen_flags: <defaults>
</compile_context>

<pallas_src>
import functools

import jax
import jax.numpy as jnp
from jax import lax
from jax.experimental import pallas as pl
from jax.experimental.pallas import tpu as pltpu

LANE = 128  # vreg lane width; batch tiles are multiples of this.


def _supports_bf16_eup():
    """v6e/v7x have a bf16 EUP; v5e and older do not (bf16 exp not faster/safe)."""
    try:
        kind = jax.devices()[0].device_kind.lower()
    except Exception:  # pragma: no cover - defensive
        return False
    return not any(tag in kind for tag in ("v2", "v3", "v4", "v5"))


def _mlp_kernel(*refs, num_layers, compute_dtype, fast_math, exp_dtype):
    """One batch tile of the fused MLP.

    Ref layouts:
      refs[0]        : x tile, natural [tile_b, d_in]
      refs[1 + 2*l]  : layer-l weight
                         layers 0..L-2 : transposed [cout, cin]
                         last layer    : natural    [cin,  cout]
      refs[2 + 2*l]  : layer-l bias (f32)
                         layers 0..L-2 : [cout, 1]
                         last layer    : [1, cout]
      refs[-1]       : output tile, natural [tile_b, d_out]

    Intermediates are lane-dense ([ch, tile_b], batch on the 128-lane axis);
    the first/last matmuls fold the layout change into the MXU (dot_general
    contraction dims), so no explicit transpose of x or y is needed.
    """
    x_ref = refs[0]
    o_ref = refs[-1]
    wb = refs[1:-1]

    def swish(h):  # h is the f32 MXU accumulator
        if exp_dtype == jnp.float32:
            e = jnp.exp(-h)
        else:
            # bf16 exp doubles EUP throughput on v6e/v7x; result back to f32.
            e = jnp.exp((-h).astype(exp_dtype)).astype(jnp.float32)
        if fast_math:
            s = pl.reciprocal(1.0 + e, approx=True)   # EUP approx reciprocal
        else:
            s = 1.0 / (1.0 + e)                        # exact path
        return s * h

    # Layer 0: contract d_in of x directly (x stays natural); result is
    # lane-dense [ch, tile_b] with f32 accumulation.
    h = lax.dot_general(
        wb[0][...], x_ref[...].astype(compute_dtype),
        (((1,), (1,)), ((), ())),
        preferred_element_type=jnp.float32) + wb[1][...]
    h = swish(h).astype(compute_dtype)

    # Hidden layers: plain W @ h in the lane-dense layout.
    for l in range(1, num_layers - 1):
        w = wb[2 * l][...]
        b = wb[2 * l + 1][...]
        h = jnp.dot(w, h, preferred_element_type=jnp.float32) + b
        h = swish(h).astype(compute_dtype)

    # Last layer: contract the feature axis of h against W's cin axis so the
    # result comes out directly in the natural [tile_b, d_out] layout.
    wl = wb[2 * (num_layers - 1)][...]
    bl = wb[2 * (num_layers - 1) + 1][...]
    y = lax.dot_general(h, wl, (((0,), (0,)), ((), ())),
                        preferred_element_type=jnp.float32) + bl
    o_ref[...] = y.astype(o_ref.dtype)


def prepare_mlp_params(params, compute_dtype=jnp.float32):
    """One-time weight prep (hoisted out of the hot path).

    params : list of (W, b) with W [cin, cout], b [cout]; math is y = x @ W + b
             (i.e. W = W_pytorch.T).
    Returns kernel-layout params:
      layers 0..L-2: (W.T [cout, cin] in compute_dtype, b [cout, 1] f32)
      last layer   : (W   [cin, cout] in compute_dtype, b [1, cout] f32)
    """
    compute_dtype = jnp.dtype(compute_dtype)
    prepared = []
    n = len(params)
    for li, (w, b) in enumerate(params):
        cin, cout = w.shape
        if li < n - 1:
            w_k = jnp.asarray(w, jnp.float32).T.astype(compute_dtype)  # [cout, cin]
            b_k = jnp.asarray(b, jnp.float32).reshape(cout, 1)
        else:
            w_k = jnp.asarray(w, jnp.float32).astype(compute_dtype)    # [cin, cout]
            b_k = jnp.asarray(b, jnp.float32).reshape(1, cout)
        prepared.append((w_k, b_k))
    return prepared


def mlp_forward(x, prepared_params, *, batch_tile=8192, fast_math=None):
    """Fused MLP forward pass.

    x               : [batch, d_in] float32 (natural PyTorch layout).
    prepared_params : output of prepare_mlp_params (its dtype selects the
                      compute path: f32 exact, or bf16 MXU with f32 accum).
    batch_tile      : max rows per grid step (multiple of 128).  8192 keeps
                      per-step overhead negligible while using <2 MiB of VMEM
                      double-buffered -- fine even on v7x's 64 MiB VMEM.
    """
    batch, d_in = x.shape
    num_layers = len(prepared_params)
    d_out = prepared_params[-1][0].shape[1]
    compute_dtype = jnp.dtype(prepared_params[0][0].dtype)
    if fast_math is None:
        fast_math = compute_dtype == jnp.dtype(jnp.bfloat16)
    exp_dtype = jnp.bfloat16 if (fast_math and _supports_bf16_eup()) else jnp.float32

    # ---- batch tiling (no jnp.pad; ragged tail is masked by Pallas) --------
    padded = pl.cdiv(batch, LANE) * LANE          # conceptual only
    tile_b = max(LANE, min(batch_tile, padded))
    tile_b = pl.cdiv(tile_b, LANE) * LANE
    # Megacore (v7x has 2 TensorCores): guarantee >= 2 batch tiles when the
    # batch allows it so both cores get work.
    if padded // tile_b < 2 and padded >= 2 * LANE:
        tile_b = pl.cdiv(pl.cdiv(padded, 2), LANE) * LANE
    grid = (pl.cdiv(batch, tile_b),)

    flat_args = [x]
    in_specs = [pl.BlockSpec((tile_b, d_in), lambda i: (i, 0))]
    for (w, b) in prepared_params:
        flat_args.extend([w, b])
        # Grid-invariant index_map -> weights/biases stay resident in VMEM.
        in_specs.append(pl.BlockSpec(w.shape, lambda i: (0, 0)))
        in_specs.append(pl.BlockSpec(b.shape, lambda i: (0, 0)))

    kernel = functools.partial(
        _mlp_kernel,
        num_layers=num_layers,
        compute_dtype=compute_dtype,
        fast_math=fast_math,
        exp_dtype=exp_dtype,
    )

    return pl.pallas_call(
        kernel,
        out_shape=jax.ShapeDtypeStruct((batch, d_out), jnp.float32),
        grid=grid,
        in_specs=in_specs,
        out_specs=pl.BlockSpec((tile_b, d_out), lambda i: (i, 0)),
        compiler_params=pltpu.CompilerParams(
            # Batch tiles are independent -> shard across TensorCores (v7x).
            dimension_semantics=("parallel",),
        ),
    )(*flat_args)


def init_mlp_params(key, d_in, ch, d_out, num_layers=3):
    """Deterministic parameter init matching the PyTorch MLP layer shapes."""
    chs = [d_in] + num_layers * [ch]
    dims = list(zip(chs, chs[1:])) + [(chs[-1], d_out)]
    params = []
    for (cin, cout) in dims:
        key, kw, kb = jax.random.split(key, 3)
        bound = 1.0 / jnp.sqrt(jnp.float32(cin))  # nn.Linear-like default scale
        w = jax.random.uniform(kw, (cin, cout), jnp.float32, -bound, bound)
        b = jax.random.uniform(kb, (cout,), jnp.float32, -bound, bound)
        params.append((w, b))
    return params


def mlp_reference(x, params):
    """Plain-JAX reference of the same forward pass (for verification)."""
    h = x
    for (w, b) in params[:-1]:
        h = h @ w + b
        h = jax.nn.sigmoid(h) * h
    w, b = params[-1]
    return h @ w + b


if __name__ == "__main__":
    key = jax.random.PRNGKey(0)

    # Small shapes consistent with the module's forward: x is [batch, d_in].
    batch, d_in, ch, d_out = 256, 16, 32, 8

    key, kx = jax.random.split(key)
    x = jax.random.normal(kx, (batch, d_in), jnp.float32)
    params = init_mlp_params(key, d_in, ch, d_out, num_layers=3)

    y_ref = mlp_reference(x, params)

    # Exact f32 path (tile auto-split to 2 tiles -> exercises the pipeline /
    # both v7x cores).
    p_f32 = prepare_mlp_params(params, jnp.float32)
    y = jax.block_until_ready(mlp_forward(x, p_f32))
    assert y.shape == (batch, d_out)
    assert jnp.allclose(y, y_ref, atol=1e-4, rtol=1e-4), \
        "Pallas f32 output mismatch vs reference"

    # bf16 MXU path: bf16 weights/activations, f32 accumulation, EUP fast-math
    # swish (looser tolerance; inputs are quantized to bf16 before each dot).
    p_bf16 = prepare_mlp_params(params, jnp.bfloat16)
    y_bf16 = jax.block_until_ready(mlp_forward(x, p_bf16))
    assert jnp.allclose(y_bf16, y_ref, atol=5e-2, rtol=5e-2), \
        "Pallas bf16 output mismatch vs reference"

    # Ragged batch (not a tile multiple): no jnp.pad, Pallas masks the tail.
    x_r = x[:200]
    y_r = jax.block_until_ready(mlp_forward(x_r, p_f32))
    assert jnp.allclose(y_r, mlp_reference(x_r, params), atol=1e-4, rtol=1e-4), \
        "Pallas ragged-batch output mismatch vs reference"

    print("KERNEL_OK")
</pallas_src>

<mosaic_0001>
module attributes {stable_mosaic.version = 11 : i64} {
  func.func @_mlp_kernel(%arg0: i32, %arg1: memref<128x16xf32, #tpu.memory_space<vmem>>, %arg2: memref<32x16xf32, #tpu.memory_space<vmem>>, %arg3: memref<32x1xf32, #tpu.memory_space<vmem>>, %arg4: memref<32x32xf32, #tpu.memory_space<vmem>>, %arg5: memref<32x1xf32, #tpu.memory_space<vmem>>, %arg6: memref<32x32xf32, #tpu.memory_space<vmem>>, %arg7: memref<32x1xf32, #tpu.memory_space<vmem>>, %arg8: memref<32x8xf32, #tpu.memory_space<vmem>>, %arg9: memref<1x8xf32, #tpu.memory_space<vmem>>, %arg10: memref<128x8xf32, #tpu.memory_space<vmem>>) attributes {dimension_semantics = [#tpu.dimension_semantics<parallel>], iteration_bounds = array<i64: 2>, scalar_prefetch = 0 : i64, scratch_operands = 0 : i64, tpu.core_type = #tpu.core_type<tc>, window_params = [{transform_indices = @transform_0, window_bounds = array<i64: 128, 16>}, {pipeline_mode = #tpu.pipeline_mode<synchronous>, transform_indices = @transform_1, window_bounds = array<i64: 32, 16>}, {pipeline_mode = #tpu.pipeline_mode<synchronous>, transform_indices = @transform_2, window_bounds = array<i64: 32, 1>}, {pipeline_mode = #tpu.pipeline_mode<synchronous>, transform_indices = @transform_3, window_bounds = array<i64: 32, 32>}, {pipeline_mode = #tpu.pipeline_mode<synchronous>, transform_indices = @transform_4, window_bounds = array<i64: 32, 1>}, {pipeline_mode = #tpu.pipeline_mode<synchronous>, transform_indices = @transform_5, window_bounds = array<i64: 32, 32>}, {pipeline_mode = #tpu.pipeline_mode<synchronous>, transform_indices = @transform_6, window_bounds = array<i64: 32, 1>}, {pipeline_mode = #tpu.pipeline_mode<synchronous>, transform_indices = @transform_7, window_bounds = array<i64: 32, 8>}, {pipeline_mode = #tpu.pipeline_mode<synchronous>, transform_indices = @transform_8, window_bounds = array<i64: 1, 8>}, {transform_indices = @transform_9, window_bounds = array<i64: 128, 8>}]} {
    %c0 = arith.constant 0 : index
    %c0_0 = arith.constant 0 : index
    %0 = vector.load %arg2[%c0, %c0_0] : memref<32x16xf32, #tpu.memory_space<vmem>>, vector<32x16xf32>
    %c0_1 = arith.constant 0 : index
    %c0_2 = arith.constant 0 : index
    %1 = vector.load %arg1[%c0_1, %c0_2] : memref<128x16xf32, #tpu.memory_space<vmem>>, vector<128x16xf32>
    %cst = arith.constant dense<0.000000e+00> : vector<32x128xf32>
    %2 = tpu.matmul %0, %1, %cst {dimension_numbers = #tpu.dot_dimension_numbers<[1], [1], [0], [0], [0, 0, 1, 0], [], []>} : vector<32x16xf32>, vector<128x16xf32>, vector<32x128xf32> -> vector<32x128xf32>
    %c0_3 = arith.constant 0 : index
    %c0_4 = arith.constant 0 : index
    %3 = vector.load %arg3[%c0_3, %c0_4] : memref<32x1xf32, #tpu.memory_space<vmem>>, vector<32x1xf32>
    %4 = vector.broadcast %3 : vector<32x1xf32> to vector<32x128xf32>
    %5 = arith.addf %2, %4 : vector<32x128xf32>
    %cst_5 = arith.constant 0.000000e+00 : f32
    %6 = vector.broadcast %cst_5 : f32 to vector<32x128xf32>
    %7 = arith.subf %6, %5 : vector<32x128xf32>
    %8 = math.exp %7 : vector<32x128xf32>
    %cst_6 = arith.constant 1.000000e+00 : f32
    %9 = vector.broadcast %cst_6 : f32 to vector<32x128xf32>
    %10 = arith.addf %9, %8 : vector<32x128xf32>
    %cst_7 = arith.constant 1.000000e+00 : f32
    %11 = vector.broadcast %cst_7 : f32 to vector<32x128xf32>
    %12 = arith.divf %11, %10 : vector<32x128xf32>
    %13 = arith.mulf %12, %5 : vector<32x128xf32>
    %c0_8 = arith.constant 0 : index
    %c0_9 = arith.constant 0 : index
    %14 = vector.load %arg4[%c0_8, %c0_9] : memref<32x32xf32, #tpu.memory_space<vmem>>, vector<32x32xf32>
    %c0_10 = arith.constant 0 : index
    %c0_11 = arith.constant 0 : index
    %15 = vector.load %arg5[%c0_10, %c0_11] : memref<32x1xf32, #tpu.memory_space<vmem>>, vector<32x1xf32>
    %cst_12 = arith.constant dense<0.000000e+00> : vector<32x128xf32>
    %16 = tpu.matmul %14, %13, %cst_12 {dimension_numbers = #tpu.dot_dimension_numbers<[1], [0], [0], [1], [0, 0, 1, 1], [], []>} : vector<32x32xf32>, vector<32x128xf32>, vector<32x128xf32> -> vector<32x128xf32>
    %17 = vector.broadcast %15 : vector<32x1xf32> to vector<32x128xf32>
    %18 = arith.addf %16, %17 : vector<32x128xf32>
    %cst_13 = arith.constant 0.000000e+00 : f32
    %19 = vector.broadcast %cst_13 : f32 to vector<32x128xf32>
    %20 = arith.subf %19, %18 : vector<32x128xf32>
    %21 = math.exp %20 : vector<32x128xf32>
    %cst_14 = arith.constant 1.000000e+00 : f32
    %22 = vector.broadcast %cst_14 : f32 to vector<32x128xf32>
    %23 = arith.addf %22, %21 : vector<32x128xf32>
    %cst_15 = arith.constant 1.000000e+00 : f32
    %24 = vector.broadcast %cst_15 : f32 to vector<32x128xf32>
    %25 = arith.divf %24, %23 : vector<32x128xf32>
    %26 = arith.mulf %25, %18 : vector<32x128xf32>
    %c0_16 = arith.constant 0 : index
    %c0_17 = arith.constant 0 : index
    %27 = vector.load %arg6[%c0_16, %c0_17] : memref<32x32xf32, #tpu.memory_space<vmem>>, vector<32x32xf32>
    %c0_18 = arith.constant 0 : index
    %c0_19 = arith.constant 0 : index
    %28 = vector.load %arg7[%c0_18, %c0_19] : memref<32x1xf32, #tpu.memory_space<vmem>>, vector<32x1xf32>
    %cst_20 = arith.constant dense<0.000000e+00> : vector<32x128xf32>
    %29 = tpu.matmul %27, %26, %cst_20 {dimension_numbers = #tpu.dot_dimension_numbers<[1], [0], [0], [1], [0, 0, 1, 1], [], []>} : vector<32x32xf32>, vector<32x128xf32>, vector<32x128xf32> -> vector<32x128xf32>
    %30 = vector.broadcast %28 : vector<32x1xf32> to vector<32x128xf32>
    %31 = arith.addf %29, %30 : vector<32x128xf32>
    %cst_21 = arith.constant 0.000000e+00 : f32
    %32 = vector.broadcast %cst_21 : f32 to vector<32x128xf32>
    %33 = arith.subf %32, %31 : vector<32x128xf32>
    %34 = math.exp %33 : vector<32x128xf32>
    %cst_22 = arith.constant 1.000000e+00 : f32
    %35 = vector.broadcast %cst_22 : f32 to vector<32x128xf32>
    %36 = arith.addf %35, %34 : vector<32x128xf32>
    %cst_23 = arith.constant 1.000000e+00 : f32
    %37 = vector.broadcast %cst_23 : f32 to vector<32x128xf32>
    %38 = arith.divf %37, %36 : vector<32x128xf32>
    %39 = arith.mulf %38, %31 : vector<32x128xf32>
    %c0_24 = arith.constant 0 : index
    %c0_25 = arith.constant 0 : index
    %40 = vector.load %arg8[%c0_24, %c0_25] : memref<32x8xf32, #tpu.memory_space<vmem>>, vector<32x8xf32>
    %c0_26 = arith.constant 0 : index
    %c0_27 = arith.constant 0 : index
    %41 = vector.load %arg9[%c0_26, %c0_27] : memref<1x8xf32, #tpu.memory_space<vmem>>, vector<1x8xf32>
    %cst_28 = arith.constant dense<0.000000e+00> : vector<128x8xf32>
    %42 = tpu.matmul %39, %40, %cst_28 {dimension_numbers = #tpu.dot_dimension_numbers<[0], [0], [1], [1], [0, 1, 1, 1], [], []>} : vector<32x128xf32>, vector<32x8xf32>, vector<128x8xf32> -> vector<128x8xf32>
    %43 = vector.broadcast %41 : vector<1x8xf32> to vector<128x8xf32>
    %44 = arith.addf %42, %43 : vector<128x8xf32>
    %c0_29 = arith.constant 0 : index
    %c0_30 = arith.constant 0 : index
    %45 = vector.load %arg10[%c0_29, %c0_30] : memref<128x8xf32, #tpu.memory_space<vmem>>, vector<128x8xf32>
    tpu.vector_store %arg10[%c0_29, %c0_30], %44 {strides = array<i32>} : memref<128x8xf32, #tpu.memory_space<vmem>>, vector<128x8xf32>,
    return
  }
  func.func @transform_0(%arg0: i32) -> (i32, i32) {
    %c0_i32 = arith.constant 0 : i32
    %c0_i32_0 = arith.constant 0 : i32
    return %arg0, %c0_i32 : i32, i32
  }
  func.func @transform_1(%arg0: i32) -> (i32, i32) {
    %c0_i32 = arith.constant 0 : i32
    %c0_i32_0 = arith.constant 0 : i32
    %c0_i32_1 = arith.constant 0 : i32
    return %c0_i32, %c0_i32_0 : i32, i32
  }
  func.func @transform_2(%arg0: i32) -> (i32, i32) {
    %c0_i32 = arith.constant 0 : i32
    %c0_i32_0 = arith.constant 0 : i32
    %c0_i32_1 = arith.constant 0 : i32
    return %c0_i32, %c0_i32_0 : i32, i32
  }
  func.func @transform_3(%arg0: i32) -> (i32, i32) {
    %c0_i32 = arith.constant 0 : i32
    %c0_i32_0 = arith.constant 0 : i32
    %c0_i32_1 = arith.constant 0 : i32
    return %c0_i32, %c0_i32_0 : i32, i32
  }
  func.func @transform_4(%arg0: i32) -> (i32, i32) {
    %c0_i32 = arith.constant 0 : i32
    %c0_i32_0 = arith.constant 0 : i32
    %c0_i32_1 = arith.constant 0 : i32
    return %c0_i32, %c0_i32_0 : i32, i32
  }
  func.func @transform_5(%arg0: i32) -> (i32, i32) {
    %c0_i32 = arith.constant 0 : i32
    %c0_i32_0 = arith.constant 0 : i32
    %c0_i32_1 = arith.constant 0 : i32
    return %c0_i32, %c0_i32_0 : i32, i32
  }
  func.func @transform_6(%arg0: i32) -> (i32, i32) {
    %c0_i32 = arith.constant 0 : i32
    %c0_i32_0 = arith.constant 0 : i32
    %c0_i32_1 = arith.constant 0 : i32
    return %c0_i32, %c0_i32_0 : i32, i32
  }
  func.func @transform_7(%arg0: i32) -> (i32, i32) {
    %c0_i32 = arith.constant 0 : i32
    %c0_i32_0 = arith.constant 0 : i32
    %c0_i32_1 = arith.constant 0 : i32
    return %c0_i32, %c0_i32_0 : i32, i32
  }
  func.func @transform_8(%arg0: i32) -> (i32, i32) {
    %c0_i32 = arith.constant 0 : i32
    %c0_i32_0 = arith.constant 0 : i32
    %c0_i32_1 = arith.constant 0 : i32
    return %c0_i32, %c0_i32_0 : i32, i32
  }
  func.func @transform_9(%arg0: i32) -> (i32, i32) {
    %c0_i32 = arith.constant 0 : i32
    %c0_i32_0 = arith.constant 0 : i32
    return %arg0, %c0_i32 : i32, i32
  }
}

</mosaic_0001>

<bundles_post_ra>
// kernel: tpu_custom_call.1
= control target key start
LH: loop header
LB: loop body
LE: loop exit
PB: predicated region body
PF: predicated region fallthrough
CT: control target
= control target key end

     0   :  { %s1571_s30 = smov 0   ;;  %s1800_s0 = inlined_call_operand.vmem [shape: f32[256,16], index: 0, kind: input, shape index: {}]   ;;  %s1801_s1 = inlined_call_operand.vmem [shape: f32[32,16], index: 1, kind: input, shape index: {}]   ;;  %s1802_s2 = inlined_call_operand.vmem [shape: f32[32,1], index: 2, kind: input, shape index: {}]   ;;  %s1803_s3 = inlined_call_operand.vmem [shape: f32[32,32], index: 3, kind: input, shape index: {}]   ;;  %s1804_s4 = inlined_call_operand.vmem [shape: f32[32,1], index: 4, kind: input, shape index: {}]   ;;  %s1805_s5 = inlined_call_operand.vmem [shape: f32[32,32], index: 5, kind: input, shape index: {}]   ;;  %s1806_s6 = inlined_call_operand.vmem [shape: f32[32,1], index: 6, kind: input, shape index: {}]   ;;  %s1807_s7 = inlined_call_operand.vmem [shape: f32[32,8], index: 7, kind: input, shape index: {}]   ;;  %s1808_s8 = inlined_call_operand.vmem [shape: f32[1,8], index: 8, kind: input, shape index: {}]   ;;  %s1809_s9 = inlined_call_operand.vmem [shape: f32[256,8], index: 9, kind: output, shape index: {}]  }
   0x1 LB: > { %s1170_s10 = sadd.s32 4294967295, %s1518_s30   ;;  %p1174_p0 = scmp.ge.s32.totalorder %s1518_s30, 1  ;;  %s1518_s30 = sphi %s1571_s30, %s19_s30  }
   0x2   : > { %p288_p1 = scmp.lt.s32.totalorder %s1518_s30, 3 }
   0x4   : > { %p289_p2 = pnand %p1174_p0, %p288_p1 }
   0x5   : > { %s1175_s11 = sshll.u32 (!%p289_p2), %s1170_s10, 4  ;;  %vm380_vm0 = vcmask (!%p289_p2), 130048   ;;  %v336_v0 = vld [vmem:[%s1801_s1] sm:$0xff] (!%p289_p2)  ;;  %v1520_v1 = vmov (!%p289_p2), 0   ;;  %v358_v3 = vld [vmem:[%s1802_s2 + $0x10] sm:$0xff] (!%p289_p2)  ;;  %v357_v4 = vld [vmem:[%s1802_s2 + $0x8] sm:$0xff] (!%p289_p2) }
   0x6   : > { %292 = sbr.rel (%p289_p2) target bundleno = 1243 (0x4db), region = 56  ;;  %p325_p3 = scmp.lt.s32.totalorder (!%p289_p2), %s1175_s11, 31  ;;  %1314 = vmatprep.mubr.msk.f32.mxu0 (!%p289_p2), %vm380_vm0, %v336_v0  ;;  %1462 = vset.pattern.permute.xlu0 (!%p289_p2), %v1520_v1  ;;  %v356_v2 = vld [vmem:[%s1802_s2] sm:$0xff] (!%p289_p2)  ;;  %v359_v5 = vld [vmem:[%s1802_s2 + $0x18] sm:$0xff] (!%p289_p2)  ;;  %vm1607_vm1 = vmpackc.low (!%p289_p2), %vm380_vm0, %vm380_vm0  ;;  %vm582_vm2 = vcmask (!%p289_p2), 261120   ;;  %vm1097_vm3 = vcmask (!%p289_p2), 64512  }
   0x7   : > { %362 = vperm.xlu0 (!%p289_p2), %1462, %v356_v2   ;;  %1463 = vset.pattern.permute.xlu1 (!%p289_p2), %v1520_v1  ;;  %v558_v7 = vld [vmem:[%s1804_s4] sm:$0xff] (!%p289_p2)  ;;  %v559_v13 = vld [vmem:[%s1804_s4 + $0x8] sm:$0xff] (!%p289_p2)  ;;  %v560_v15 = vld [vmem:[%s1804_s4 + $0x10] sm:$0xff] (!%p289_p2) }
   0x8   : > { %372 = vperm.xlu1 (!%p289_p2), %1463, %v358_v3   ;;  %v561_v16 = vld [vmem:[%s1804_s4 + $0x18] sm:$0xff] (!%p289_p2)  ;;  %v712_v19 = vld [vmem:[%s1806_s6] sm:$0xff] (!%p289_p2)  ;;  %v713_v21 = vld [vmem:[%s1806_s6 + $0x8] sm:$0xff] (!%p289_p2) }
   0x9   : > { %v714_v22 = vld [vmem:[%s1806_s6 + $0x10] sm:$0xff] (!%p289_p2)  ;;  %v715_v23 = vld [vmem:[%s1806_s6 + $0x18] sm:$0xff] (!%p289_p2)  ;;  %v337_v39 = vld [vmem:[%s1801_s1 + $0x8] sm:$0xff] (!%p289_p2) }
   0xa   : > { %v338_v40 = vld [vmem:[%s1801_s1 + $0x10] sm:$0xff] (!%p289_p2)  ;;  %v339_v41 = vld [vmem:[%s1801_s1 + $0x18] sm:$0xff] (!%p289_p2)  ;;  %v554_v42 = vld [vmem:[%s1803_s3] sm:$0xff] (!%p289_p2) }
   0xb   : > { %367 = vperm.xlu0 (!%p289_p2), %1462, %v357_v4   ;;  %1328 = vmatprep.mubr.msk.f32.mxu1 (!%p289_p2), %vm582_vm2, %v554_v42 }
   0xc   : > { %377 = vperm.xlu1 (!%p289_p2), %1463, %v359_v5  }
   0xd   : > { %s1813_s11 = smov (!%p325_p3, %s1175_s11), 31 }
   0xe   : > { %s1176_s22 = sshll.u32 %s1813_s11, 3 }
   0xf   : > { %s1603_s25 = scalar_lea.vmem %s1800_s0, %s1176_s22  ;;  %564 = vperm.xlu0 %1462, %v558_v7   ;;  %s1763_s21 = scalar_lea.vmem %s1809_s9, %s1176_s22 }
  0x10   : > { %v340_v8 = vld [vmem:[%s1603_s25] sm:$0xff]  ;;  %v341_v9 = vld [vmem:[%s1603_s25 + $0x8] sm:$0xff]  ;;  %v342_v10 = vld [vmem:[%s1603_s25 + $0x10] sm:$0xff]  ;;  %569 = vperm.xlu1 %1463, %v559_v13  }
  0x11   : > { %v1380_v11 = vpack.c.bf16 %v341_v9, %v340_v8  ;;  %v343_v12 = vld [vmem:[%s1603_s25 + $0x18] sm:$0xff]  ;;  %v344_v17 = vld [vmem:[%s1603_s25 + $0x20] sm:$0xff]  ;;  %v345_v18 = vld [vmem:[%s1603_s25 + $0x28] sm:$0xff] }
  0x12   : > { %v1386_v14 = vpack.c.bf16 %v343_v12, %v342_v10  ;;  %v1392_v20 = vpack.c.bf16 %v345_v18, %v344_v17  ;;  %v346_v24 = vld [vmem:[%s1603_s25 + $0x30] sm:$0xff]  ;;  %v347_v25 = vld [vmem:[%s1603_s25 + $0x38] sm:$0xff]  ;;  %v348_v27 = vld [vmem:[%s1603_s25 + $0x40] sm:$0xff] }
  0x13   : > { %1382 = vmatprep.subr.msk.bf16.mxu0 %vm1607_vm1, %v1380_v11  ;;  %574 = vperm.xlu0 %1462, %v560_v15   ;;  %v1398_v26 = vpack.c.bf16 %v347_v25, %v346_v24  ;;  %v349_v28 = vld [vmem:[%s1603_s25 + $0x48] sm:$0xff]  ;;  %v350_v30 = vld [vmem:[%s1603_s25 + $0x50] sm:$0xff]  ;;  %v351_v31 = vld [vmem:[%s1603_s25 + $0x58] sm:$0xff] }
  0x14   : > { %1385 = vmatpush3.bf16.xpose.msk.msra.mxu0 %vm1607_vm1, %v1380_v11  ;;  %579 = vperm.xlu1 %1463, %v561_v16   ;;  %v1404_v29 = vpack.c.bf16 %v349_v28, %v348_v27  ;;  %v1410_v32 = vpack.c.bf16 %v351_v31, %v350_v30  ;;  %v352_v33 = vld [vmem:[%s1603_s25 + $0x60] sm:$0xff]  ;;  %v353_v34 = vld [vmem:[%s1603_s25 + $0x68] sm:$0xff]  ;;  %v354_v36 = vld [vmem:[%s1603_s25 + $0x70] sm:$0xff] }
  0x15   : > { %1388 = vmatprep.subr.msk.bf16.mxu0 %vm1607_vm1, %v1386_v14  ;;  %v1416_v35 = vpack.c.bf16 %v353_v34, %v352_v33  ;;  %v355_v37 = vld [vmem:[%s1603_s25 + $0x78] sm:$0xff]  ;;  %v555_v17 = vld [vmem:[%s1803_s3 + $0x8] sm:$0xff]  ;;  %v556_v18 = vld [vmem:[%s1803_s3 + $0x10] sm:$0xff] }
  0x16   : > { %v1422_v38 = vpack.c.bf16 %v355_v37, %v354_v36 }
  0x17   : > { %718 = vperm.xlu0 %1462, %v712_v19   ;;  %v557_v19 = vld [vmem:[%s1803_s3 + $0x18] sm:$0xff] }
  0x18   : > { %723 = vperm.xlu1 %1463, %v713_v21  }
  0x1b   : > { %728 = vperm.xlu0 %1462, %v714_v22  }
  0x1c   : > { %1391 = vmatpush3.bf16.xpose.msk.msra.mxu0 %vm1607_vm1, %v1386_v14  ;;  %733 = vperm.xlu1 %1463, %v715_v23  }
  0x1d   : > { %1394 = vmatprep.subr.msk.bf16.mxu0 %vm1607_vm1, %v1392_v20 }
  0x24   : > { %1397 = vmatpush3.bf16.xpose.msk.msra.mxu0 %vm1607_vm1, %v1392_v20  ;;  %v708_v20 = vld [vmem:[%s1805_s5] sm:$0xff] }
  0x25   : > { %1400 = vmatprep.subr.msk.bf16.mxu0 %vm1607_vm1, %v1398_v26 }
  0x2c   : > { %1403 = vmatpush3.bf16.xpose.msk.msra.mxu0 %vm1607_vm1, %v1398_v26 }
  0x2d   : > { %1406 = vmatprep.subr.msk.bf16.mxu0 %vm1607_vm1, %v1404_v29 }
  0x34   : > { %1409 = vmatpush3.bf16.xpose.msk.msra.mxu0 %vm1607_vm1, %v1404_v29 }
  0x35   : > { %1412 = vmatprep.subr.msk.bf16.mxu0 %vm1607_vm1, %v1410_v32 }
  0x3c   : > { %1415 = vmatpush3.bf16.xpose.msk.msra.mxu0 %vm1607_vm1, %v1410_v32 }
  0x3d   : > { %1418 = vmatprep.subr.msk.bf16.mxu0 %vm1607_vm1, %v1416_v35 }
  0x44   : > { %1421 = vmatpush3.bf16.xpose.msk.msra.mxu0 %vm1607_vm1, %v1416_v35 }
  0x45   : > { %1424 = vmatprep.subr.msk.bf16.mxu0 %vm1607_vm1, %v1422_v38 }
  0x4c   : > { %1427 = vmatpush3.bf16.xpose.msk.msra.mxu0 %vm1607_vm1, %v1422_v38 }
  0x53   : > { %1315 = vmatmul.mubr.msk.f32.vlgmr.msra.gmra.mrb[0].mxu0 %vm380_vm0, %v337_v39 }
  0x54   : > { %1317 = vmatprep.mubr.msk.f32.mxu0 %vm380_vm0, %v338_v40 }
  0x57   : > { %1318 = vmatmul.mubr.msk.f32.gmra.mrb[2].mxu0 %vm380_vm0, %v339_v41 }
  0x86   : > { %v363_v43 = vpop.permute.xlu0 %362 }
  0x87   : > { %v373_v44 = vpop.permute.xlu1 %372 }
  0x8a   : > { %v368_v45 = vpop.permute.xlu0 %367 }
  0x8b   : > { %v378_v51 = vpop.permute.xlu1 %377 }
  0x8e   : > { %v565_v22 = vpop.permute.xlu0 %564 }
  0x8f   : > { %v570_v21 = vpop.permute.xlu1 %569 }
  0x92   : > { %v575_v31 = vpop.permute.xlu0 %574 }
  0x93   : > { %v580_v28 = vpop.permute.xlu1 %579 }
 0x126   : > { %v1316_v46 = vpop.f32.mrb[0].mxu0 }
 0x127   : > { %v513_v47 = vadd.f32 %v1316_v46, %v368_v45  ;;  %v507_v48 = vpop.f32.mrb[1].mxu0 }
 0x128   : > { %v508_v49 = vadd.f32 %v507_v48, %v363_v43 }
 0x129   : > { %v527_v50 = vsub.f32 0.0, %v513_v47 }
 0x12a   : > { %v526_v52 = vsub.f32 0.0, %v508_v49  ;;  %v1319_v53 = vpop.f32.mrb[2].mxu0 }
 0x12b   : > { %v532_v54 = vmul.f32 1.442695, %v527_v50  ;;  %v523_v55 = vadd.f32 %v1319_v53, %v378_v51  ;;  %v517_v56 = vpop.f32.mrb[3].mxu0 }
 0x12c   : > { %v530_v57 = vmul.f32 1.442695, %v526_v52  ;;  %v518_v58 = vadd.f32 %v517_v56, %v373_v44 }
 0x12d   : > { %1464 = vpow2.f32 %v532_v54  ;;  %v529_v59 = vsub.f32 0.0, %v523_v55 }
 0x12e   : > { %1466 = vpow2.f32 %v530_v57  ;;  %v528_v60 = vsub.f32 0.0, %v518_v58 }
 0x12f   : > { %v536_v61 = vmul.f32 1.442695, %v529_v59  ;;  %v709_v59 = vld [vmem:[%s1805_s5 + $0x8] sm:$0xff] }
 0x130   : > { %v534_v62 = vmul.f32 1.442695, %v528_v60  ;;  %v710_v60 = vld [vmem:[%s1805_s5 + $0x10] sm:$0xff] }
 0x131   : > { %1468 = vpow2.f32 %v536_v61  ;;  %v711_v61 = vld [vmem:[%s1805_s5 + $0x18] sm:$0xff] }
 0x132   : > { %1470 = vpow2.f32 %v534_v62  ;;  %v861_v62 = vld [vmem:[%s1807_s7] sm:$0xff] }
 0x137   : > { %v1465_v63 = vpop.eup %1464 }
 0x138   : > { %v1467_v0 = vpop.eup %1466  ;;  %v539_v1 = vadd.f32 1.0, %v1465_v63  ;;  %v862_v63 = vld [vmem:[%s1807_s7 + $0x8] sm:$0xff] }
 0x139   : > { %v538_v2 = vadd.f32 1.0, %v1467_v0  ;;  %v1444_v0 = vpack.c.bf16 %v862_v63, %v861_v62 }
 0x13a   : > { %1472 = vrcp.f32 %v539_v1  ;;  %v724_v1 = vpop.permute.xlu1 %723 }
 0x13b   : > { %v1469_v3 = vpop.eup %1468  ;;  %1474 = vrcp.f32 %v538_v2  ;;  %v719_v2 = vpop.permute.xlu0 %718 }
 0x13c   : > { %v1471_v4 = vpop.eup %1470  ;;  %v541_v5 = vadd.f32 1.0, %v1469_v3 }
 0x13d   : > { %v540_v6 = vadd.f32 1.0, %v1471_v4 }
 0x13e   : > { %1476 = vrcp.f32 %v541_v5 }
 0x13f   : > { %1478 = vrcp.f32 %v540_v6 }
 0x144   : > { %v1473_v7 = vpop.eup %1472 }
 0x145   : > { %v1475_v8 = vpop.eup %1474  ;;  %v551_v9 = vmul.f32 %v1473_v7, %v513_v47 }
 0x146   : > { %v550_v10 = vmul.f32 %v1475_v8, %v508_v49  ;;  %v734_v8 = vpop.permute.xlu1 %733 }
 0x148   : > { %v1477_v11 = vpop.eup %1476  ;;  %v1428_v12 = vpack.c.bf16 %v551_v9, %v550_v10 }
 0x149   : > { %v1479_v13 = vpop.eup %1478  ;;  %v553_v14 = vmul.f32 %v1477_v11, %v523_v55  ;;  %v729_v11 = vpop.permute.xlu0 %728 }
 0x14a   : > { %v552_v15 = vmul.f32 %v1479_v13, %v518_v58  ;;  %1429 = vmatprep.subr.bf16.mxu1 %v1428_v12 }
 0x14b   : > { %1431 = vmatpush3.bf16.msra.mxu1 %v1428_v12 }
 0x14c   : > { %v1432_v16 = vpack.c.bf16 %v553_v14, %v552_v15 }
 0x14e   : > { %1433 = vmatprep.subr.bf16.mxu1 %v1432_v16 }
 0x14f   : > { %1435 = vmatpush3.bf16.msra.mxu1 %v1432_v16 }
 0x152   : > { %1329 = vmatmul.mubr.msk.f32.vlgmr.msra.gmra.mrb[0].mxu1 %vm582_vm2, %v555_v17 }
 0x153   : > { %1331 = vmatprep.mubr.msk.f32.mxu1 %vm582_vm2, %v556_v18 }
 0x156   : > { %1332 = vmatmul.mubr.msk.f32.gmra.mrb[2].mxu1 %vm582_vm2, %v557_v19 }
 0x157   : > { %1342 = vmatprep.mubr.msk.f32.mxu1 %vm582_vm2, %v708_v20 }
 0x225   : > { %v1330_v23 = vpop.f32.mrb[0].mxu1 }
 0x226   : > { %v667_v24 = vadd.f32 %v1330_v23, %v570_v21  ;;  %v661_v25 = vpop.f32.mrb[1].mxu1 }
 0x227   : > { %v662_v26 = vadd.f32 %v661_v25, %v565_v22 }
 0x228   : > { %v681_v27 = vsub.f32 0.0, %v667_v24 }
 0x229   : > { %v680_v29 = vsub.f32 0.0, %v662_v26  ;;  %v1333_v30 = vpop.f32.mrb[2].mxu1 }
 0x22a   : > { %v686_v32 = vmul.f32 1.442695, %v681_v27  ;;  %v677_v33 = vadd.f32 %v1333_v30, %v580_v28  ;;  %v671_v34 = vpop.f32.mrb[3].mxu1 }
 0x22b   : > { %v684_v35 = vmul.f32 1.442695, %v680_v29  ;;  %v672_v36 = vadd.f32 %v671_v34, %v575_v31  ;;  %v863_v31 = vld [vmem:[%s1807_s7 + $0x10] sm:$0xff] }
 0x22c   : > { %1480 = vpow2.f32 %v686_v32  ;;  %v683_v37 = vsub.f32 0.0, %v677_v33  ;;  %v864_v32 = vld [vmem:[%s1807_s7 + $0x18] sm:$0xff] }
 0x22d   : > { %1482 = vpow2.f32 %v684_v35  ;;  %v682_v38 = vsub.f32 0.0, %v672_v36  ;;  %v1448_v34 = vpack.c.bf16 %v864_v32, %v863_v31 }
 0x22e   : > { %v690_v39 = vmul.f32 1.442695, %v683_v37 }
 0x22f   : > { %v688_v40 = vmul.f32 1.442695, %v682_v38 }
 0x230   : > { %1484 = vpow2.f32 %v690_v39 }
 0x231   : > { %1486 = vpow2.f32 %v688_v40 }
 0x236   : > { %v1481_v41 = vpop.eup %1480 }
 0x237   : > { %v1483_v42 = vpop.eup %1482  ;;  %v693_v43 = vadd.f32 1.0, %v1481_v41 }
 0x238   : > { %v692_v44 = vadd.f32 1.0, %v1483_v42 }
 0x239   : > { %1488 = vrcp.f32 %v693_v43 }
 0x23a   : > { %v1485_v45 = vpop.eup %1484  ;;  %1490 = vrcp.f32 %v692_v44 }
 0x23b   : > { %v1487_v46 = vpop.eup %1486  ;;  %v695_v47 = vadd.f32 1.0, %v1485_v45 }
 0x23c   : > { %v694_v48 = vadd.f32 1.0, %v1487_v46 }
 0x23d   : > { %1492 = vrcp.f32 %v695_v47 }
 0x23e   : > { %1494 = vrcp.f32 %v694_v48 }
 0x243   : > { %v1489_v49 = vpop.eup %1488 }
 0x244   : > { %v1491_v50 = vpop.eup %1490  ;;  %v705_v51 = vmul.f32 %v1489_v49, %v667_v24 }
 0x245   : > { %v704_v52 = vmul.f32 %v1491_v50, %v662_v26 }
 0x247   : > { %v1493_v53 = vpop.eup %1492  ;;  %v1436_v54 = vpack.c.bf16 %v705_v51, %v704_v52 }
 0x248   : > { %v1495_v55 = vpop.eup %1494  ;;  %v707_v56 = vmul.f32 %v1493_v53, %v677_v33 }
 0x249   : > { %v706_v57 = vmul.f32 %v1495_v55, %v672_v36  ;;  %1437 = vmatprep.subr.bf16.mxu1 %v1436_v54 }
 0x24a   : > { %1439 = vmatpush3.bf16.msra.mxu1 %v1436_v54 }
 0x24b   : > { %v1440_v58 = vpack.c.bf16 %v707_v56, %v706_v57  ;;  %v1207_v56 = vld [vmem:[%s1808_s8] ss:$0 sm:$0xff] }
 0x24d   : > { %1441 = vmatprep.subr.bf16.mxu1 %v1440_v58 }
 0x24e   : > { %1443 = vmatpush3.bf16.msra.mxu1 %v1440_v58 }
 0x24f   : > { %1445 = vmatprep.subr.bf16.mxu1 %v1444_v0 }
 0x251   : > { %1343 = vmatmul.mubr.msk.f32.vlgmr.msra.gmra.mrb[4].mxu1 %vm582_vm2, %v709_v59 }
 0x252   : > { %1345 = vmatprep.mubr.msk.f32.mxu1 %vm582_vm2, %v710_v60  ;;  %1447 = vmatpush3.bf16.msra.mxu1 %v1444_v0 }
 0x253   : > { %1449 = vmatprep.subr.bf16.mxu1 %v1448_v34 }
 0x255   : > { %1346 = vmatmul.mubr.msk.f32.gmra.mrb[6].mxu1 %vm582_vm2, %v711_v61 }
 0x256   : > { %1451 = vmatpush3.bf16.msra.mxu1 %v1448_v34 }
 0x324   : > { %v1344_v3 = vpop.f32.mrb[4].mxu1 }
 0x325   : > { %v820_v4 = vadd.f32 %v1344_v3, %v724_v1  ;;  %v814_v5 = vpop.f32.mrb[5].mxu1 }
 0x326   : > { %v815_v6 = vadd.f32 %v814_v5, %v719_v2 }
 0x327   : > { %v834_v7 = vsub.f32 0.0, %v820_v4 }
 0x328   : > { %v833_v9 = vsub.f32 0.0, %v815_v6  ;;  %v1347_v10 = vpop.f32.mrb[6].mxu1 }
 0x329   : > { %v839_v12 = vmul.f32 1.442695, %v834_v7  ;;  %v830_v13 = vadd.f32 %v1347_v10, %v734_v8  ;;  %v824_v14 = vpop.f32.mrb[7].mxu1 }
 0x32a   : > { %v837_v15 = vmul.f32 1.442695, %v833_v9  ;;  %v825_v16 = vadd.f32 %v824_v14, %v729_v11 }
 0x32b   : > { %1496 = vpow2.f32 %v839_v12  ;;  %v836_v17 = vsub.f32 0.0, %v830_v13 }
 0x32c   : > { %1498 = vpow2.f32 %v837_v15  ;;  %v835_v18 = vsub.f32 0.0, %v825_v16 }
 0x32d   : > { %v843_v19 = vmul.f32 1.442695, %v836_v17 }
 0x32e   : > { %v841_v20 = vmul.f32 1.442695, %v835_v18 }
 0x330   : > { %1500 = vpow2.f32 %v841_v20 }
 0x331   : > { %1502 = vpow2.f32 %v843_v19 }
 0x335   : > { %v1497_v21 = vpop.eup %1496 }
 0x336   : > { %v1499_v22 = vpop.eup %1498  ;;  %v846_v23 = vadd.f32 1.0, %v1497_v21 }
 0x337   : > { %v845_v24 = vadd.f32 1.0, %v1499_v22 }
 0x339   : > { %1504 = vrcp.f32 %v845_v24 }
 0x33a   : > { %v1501_v25 = vpop.eup %1500  ;;  %1506 = vrcp.f32 %v846_v23 }
 0x33b   : > { %v847_v26 = vadd.f32 1.0, %v1501_v25  ;;  %v1503_v27 = vpop.eup %1502 }
 0x33c   : > { %v848_v28 = vadd.f32 1.0, %v1503_v27 }
 0x33d   : > { %1508 = vrcp.f32 %v847_v26 }
 0x33e   : > { %1510 = vrcp.f32 %v848_v28 }
 0x343   : > { %v1505_v29 = vpop.eup %1504 }
 0x344   : > { %v857_v30 = vmul.f32 %v1505_v29, %v815_v6  ;;  %v1507_v33 = vpop.eup %1506 }
 0x345   : > { %v858_v35 = vmul.f32 %v1507_v33, %v820_v4 }
 0x346   : > { %872 = vxpose.xlu0.b32.start [1/4] (short) %v857_v30, 128 }
 0x347   : > { %v1509_v36 = vpop.eup %1508 }
 0x348   : > { %v859_v37 = vmul.f32 %v1509_v36, %v825_v16  ;;  %v1511_v38 = vpop.eup %1510 }
 0x349   : > { %v860_v39 = vmul.f32 %v1511_v38, %v830_v13 }
 0x34a   : > { %873 = vxpose.xlu0.b32.cont [2/4] (short) %v858_v35, 128 }
 0x34e   : > { %874 = vxpose.xlu0.b32.cont [3/4] (short) %v859_v37, 128 }
 0x352   : > { %875 = vxpose.xlu0.b32.end [4/4] (short) %v860_v39, 128 }
 0x3c6   : > { %v888_v40 = vpop.trf.xlu0 }
 0x3c7   : > { %1356 = vmatprep.mubr.msk.f32.mxu1 %vm582_vm2, %v888_v40 }
 0x3ca   : > { %v889_v41 = vpop.trf.xlu0 }
 0x3cb   : > { %1357 = vmatmul.mubr.msk.f32.vlgmr.msra.gmra.mrb[8].mxu1 %vm582_vm2, %v889_v41 }
 0x3ce   : > { %v890_v42 = vpop.trf.xlu0 }
 0x3cf   : > { %1359 = vmatprep.mubr.msk.f32.mxu1 %vm582_vm2, %v890_v42 }
 0x3d2   : > { %v891_v43 = vpop.trf.xlu0 }
 0x3d3   : > { %1360 = vmatmul.mubr.msk.f32.gmra.mrb[10].mxu1 %vm582_vm2, %v891_v43 }
 0x3d6   : > { %v892_v44 = vpop.trf.xlu0 }
 0x3d7   : > { %1362 = vmatprep.mubr.msk.f32.mxu1 %vm582_vm2, %v892_v44 }
 0x3da   : > { %v893_v45 = vpop.trf.xlu0 }
 0x3db   : > { %1363 = vmatmul.mubr.msk.f32.gmra.mrb[12].mxu1 %vm582_vm2, %v893_v45 }
 0x3de   : > { %v894_v46 = vpop.trf.xlu0 }
 0x3df   : > { %1365 = vmatprep.mubr.msk.f32.mxu1 %vm582_vm2, %v894_v46 }
 0x3e2   : > { %v895_v47 = vpop.trf.xlu0 }
 0x3e3   : > { %1366 = vmatmul.mubr.msk.f32.gmra.mrb[14].mxu1 %vm582_vm2, %v895_v47 }
 0x3e6   : > { %v896_v48 = vpop.trf.xlu0 }
 0x3e7   : > { %1368 = vmatprep.mubr.msk.f32.mxu1 %vm582_vm2, %v896_v48 }
 0x3ea   : > { %v897_v49 = vpop.trf.xlu0 }
 0x3eb   : > { %1369 = vmatmul.mubr.msk.f32.gmra.mrb[16].mxu1 %vm582_vm2, %v897_v49 }
 0x3ee   : > { %v898_v50 = vpop.trf.xlu0 }
 0x3ef   : > { %1371 = vmatprep.mubr.msk.f32.mxu1 %vm582_vm2, %v898_v50 }
 0x3f2   : > { %v899_v51 = vpop.trf.xlu0 }
 0x3f3   : > { %1372 = vmatmul.mubr.msk.f32.gmra.mrb[18].mxu1 %vm582_vm2, %v899_v51 }
 0x3f6   : > { %v900_v52 = vpop.trf.xlu0 }
 0x3f7   : > { %1374 = vmatprep.mubr.msk.f32.mxu1 %vm582_vm2, %v900_v52 }
 0x3fa   : > { %v901_v53 = vpop.trf.xlu0 }
 0x3fb   : > { %1375 = vmatmul.mubr.msk.f32.gmra.mrb[20].mxu1 %vm582_vm2, %v901_v53 }
 0x3fe   : > { %v902_v54 = vpop.trf.xlu0 }
 0x3ff   : > { %1377 = vmatprep.mubr.msk.f32.mxu1 %vm582_vm2, %v902_v54 }
 0x402   : > { %v903_v55 = vpop.trf.xlu0 }
 0x403   : > { %1378 = vmatmul.mubr.msk.f32.gmra.mrb[22].mxu1 %vm582_vm2, %v903_v55 }
 0x49e   : > { %v1358_v57 = vpop.f32.mrb[8].mxu1 }
 0x49f   : > { %v1024_v58 = vadd.f32 %v1358_v57, %v1207_v56  ;;  %v1018_v59 = vpop.f32.mrb[9].mxu1 }
 0x4a0   : > { %v1019_v60 = vadd.f32 %v1207_v56, %v1018_v59 }
 0x4a1   : > { %1099 = vst.msk [vmem:[%s1763_s21 + $0x8] sm:$0xff] %vm1097_vm3, %v1024_v58 }
 0x4a2   : > { %1098 = vst.msk [vmem:[%s1763_s21] sm:$0xff] %vm1097_vm3, %v1019_v60 }
 0x4a6   : > { %v1361_v61 = vpop.f32.mrb[10].mxu1 }
 0x4a7   : > { %v1034_v62 = vadd.f32 %v1361_v61, %v1207_v56  ;;  %v1028_v63 = vpop.f32.mrb[11].mxu1 }
 0x4a8   : > { %v1029_v0 = vadd.f32 %v1207_v56, %v1028_v63 }
 0x4a9   : > { %1101 = vst.msk [vmem:[%s1763_s21 + $0x18] sm:$0xff] %vm1097_vm3, %v1034_v62 }
 0x4aa   : > { %1100 = vst.msk [vmem:[%s1763_s21 + $0x10] sm:$0xff] %vm1097_vm3, %v1029_v0 }
 0x4ae   : > { %v1364_v1 = vpop.f32.mrb[12].mxu1 }
 0x4af   : > { %v1044_v2 = vadd.f32 %v1364_v1, %v1207_v56  ;;  %v1038_v3 = vpop.f32.mrb[13].mxu1 }
 0x4b0   : > { %v1039_v4 = vadd.f32 %v1207_v56, %v1038_v3 }
 0x4b1   : > { %1103 = vst.msk [vmem:[%s1763_s21 + $0x28] sm:$0xff] %vm1097_vm3, %v1044_v2 }
 0x4b2   : > { %1102 = vst.msk [vmem:[%s1763_s21 + $0x20] sm:$0xff] %vm1097_vm3, %v1039_v4 }
 0x4b6   : > { %v1367_v5 = vpop.f32.mrb[14].mxu1 }
 0x4b7   : > { %v1054_v6 = vadd.f32 %v1367_v5, %v1207_v56  ;;  %v1048_v7 = vpop.f32.mrb[15].mxu1 }
 0x4b8   : > { %v1049_v8 = vadd.f32 %v1207_v56, %v1048_v7 }
 0x4b9   : > { %1105 = vst.msk [vmem:[%s1763_s21 + $0x38] sm:$0xff] %vm1097_vm3, %v1054_v6 }
 0x4ba   : > { %1104 = vst.msk [vmem:[%s1763_s21 + $0x30] sm:$0xff] %vm1097_vm3, %v1049_v8 }
 0x4be   : > { %v1370_v9 = vpop.f32.mrb[16].mxu1 }
 0x4bf   : > { %v1064_v10 = vadd.f32 %v1370_v9, %v1207_v56  ;;  %v1058_v11 = vpop.f32.mrb[17].mxu1 }
 0x4c0   : > { %v1059_v12 = vadd.f32 %v1207_v56, %v1058_v11 }
 0x4c1   : > { %1107 = vst.msk [vmem:[%s1763_s21 + $0x48] sm:$0xff] %vm1097_vm3, %v1064_v10 }
 0x4c2   : > { %1106 = vst.msk [vmem:[%s1763_s21 + $0x40] sm:$0xff] %vm1097_vm3, %v1059_v12 }
 0x4c6   : > { %v1373_v13 = vpop.f32.mrb[18].mxu1 }
 0x4c7   : > { %v1074_v14 = vadd.f32 %v1373_v13, %v1207_v56  ;;  %v1068_v15 = vpop.f32.mrb[19].mxu1 }
 0x4c8   : > { %v1069_v16 = vadd.f32 %v1207_v56, %v1068_v15 }
 0x4c9   : > { %1109 = vst.msk [vmem:[%s1763_s21 + $0x58] sm:$0xff] %vm1097_vm3, %v1074_v14 }
 0x4ca   : > { %1108 = vst.msk [vmem:[%s1763_s21 + $0x50] sm:$0xff] %vm1097_vm3, %v1069_v16 }
 0x4ce   : > { %v1376_v17 = vpop.f32.mrb[20].mxu1 }
 0x4cf   : > { %v1084_v18 = vadd.f32 %v1376_v17, %v1207_v56  ;;  %v1078_v19 = vpop.f32.mrb[21].mxu1 }
 0x4d0   : > { %v1079_v20 = vadd.f32 %v1207_v56, %v1078_v19 }
 0x4d1   : > { %1111 = vst.msk [vmem:[%s1763_s21 + $0x68] sm:$0xff] %vm1097_vm3, %v1084_v18 }
 0x4d2   : > { %1110 = vst.msk [vmem:[%s1763_s21 + $0x60] sm:$0xff] %vm1097_vm3, %v1079_v20 }
 0x4d6   : > { %v1379_v21 = vpop.f32.mrb[22].mxu1 }
 0x4d7   : > { %v1094_v22 = vadd.f32 %v1379_v21, %v1207_v56  ;;  %v1088_v23 = vpop.f32.mrb[23].mxu1 }
 0x4d8   : > { %v1089_v24 = vadd.f32 %v1207_v56, %v1088_v23 }
 0x4d9   : > { %1113 = vst.msk [vmem:[%s1763_s21 + $0x78] sm:$0xff] %vm1097_vm3, %v1094_v22 }
 0x4da   : > { %1112 = vst.msk [vmem:[%s1763_s21 + $0x70] sm:$0xff] %vm1097_vm3, %v1089_v24 }
 0x4db PF: > { %s19_s30 = sadd.s32 1, %s1518_s30  }
 0x4dc   : > { %p16_p4 = scmp.ge.s32.totalorder %s19_s30, 4  }
 0x4de   :  { %18 = sbr.rel (!%p16_p4) target bundleno = 1 (0x1), region = 86 }

</bundles_post_ra>
